<compile_context>
chip_gen: v6e
topology: v6e:2x2x1
jax: 0.10.0
libtpu: 0.0.40
codegen_flags: <defaults>
</compile_context>

<pallas_src>
import functools

import jax
import jax.numpy as jnp
from jax import lax
from jax.experimental import pallas as pl
from jax.experimental.pallas import tpu as pltpu


def _self_attn_kernel(*refs, num_heads, eps, q_tile, n_q, causal, has_kpm,
                      has_attn, need_weights, flash):
    """Grid = (batch, query_tile).  Processes one query tile of one batch element."""
    it = iter(refs)
    x_ref = next(it)                                # (1,TQ,D) if flash else (1,S,D)
    kpm_ref = next(it) if has_kpm else None         # (1,n_q,1,TQ) if flash else (1,1,S)
    attn_ref = next(it) if has_attn else None       # (TQ, S) additive, streamed
    wqkv_ref = next(it)                             # (D, 3D) bf16 (= Wqkv^T, Wq pre-scaled)
    bqkv_ref = next(it)                             # (1, 3D) f32 (bq pre-scaled)
    wo_ref = next(it)                               # (D, D)  bf16 (= Wo^T)
    bo_ref = next(it)                               # (1, D)  f32
    gamma_ref = next(it)                            # (1, D)  f32
    beta_ref = next(it)                             # (1, D)  f32
    out_ref = next(it)                              # (1, TQ, D)
    attnw_ref = next(it) if need_weights else None  # (1, TQ, S)
    qkv_s = next(it)                                # VMEM scratch (S, 3D) bf16

    D = wqkv_ref.shape[0]
    S = qkv_s.shape[0]
    H = num_heads
    dh = D // H
    TQ = q_tile
    NEG = jnp.float32(-1e9)

    qi = pl.program_id(1)
    q0 = pl.multiple_of(qi * TQ, TQ)

    def ln_qkv(x_rows):
        """LayerNorm + fused QKV projection for a block of rows (f32 in, bf16 out)."""
        mean = jnp.mean(x_rows, axis=-1, keepdims=True)
        var = jnp.mean((x_rows - mean) ** 2, axis=-1, keepdims=True)
        ln = (x_rows - mean) * lax.rsqrt(var + eps)
        ln = ln * gamma_ref[...] + beta_ref[...]
        qkv = jnp.dot(ln.astype(jnp.bfloat16), wqkv_ref[...],
                      preferred_element_type=jnp.float32)
        return (qkv + bqkv_ref[...]).astype(jnp.bfloat16)

    # ---- Projection ---------------------------------------------------------
    if flash:
        # Per-tile incremental projection: rows [q0, q0+TQ).  Earlier tiles'
        # K/V are already resident in qkv_s (q axis is sequential per batch).
        qkv_s[pl.ds(q0, TQ), :] = ln_qkv(x_ref[0])
        x_tile = x_ref[0]                                     # residual rows
    else:
        # Full-sequence projection at the first query tile, chunked to TQ rows
        # so no (S,3D) f32 intermediate is ever live.
        @pl.when(qi == 0)
        def _():
            @pl.loop(0, n_q)
            def _(c):
                r0 = pl.multiple_of(c * TQ, TQ)
                qkv_s[pl.ds(r0, TQ), :] = ln_qkv(x_ref[0, pl.ds(r0, TQ), :])
        x_tile = x_ref[0, pl.ds(q0, TQ), :]                   # residual rows

    # ---- Multi-head attention on the query tile -----------------------------
    ctx_heads = []
    attn_acc = None

    if flash:
        # Causal fast path: flash-style online softmax over kv blocks [0, qi].
        n_kv = qi + 1
        row_ids = lax.broadcasted_iota(jnp.int32, (TQ, TQ), 0) + q0
        col_base = lax.broadcasted_iota(jnp.int32, (TQ, TQ), 1)
        for h in range(H):
            lo, hi = h * dh, (h + 1) * dh
            qh = qkv_s[pl.ds(q0, TQ), lo:hi]                  # (TQ, dh) bf16

            def kv_body(j, carry):
                m_i, l_i, acc = carry
                off = pl.multiple_of(j * TQ, TQ)
                kh = qkv_s[pl.ds(off, TQ), D + lo:D + hi]     # (TQkv, dh) bf16
                s = lax.dot_general(qh, kh, (((1,), (1,)), ((), ())),
                                    preferred_element_type=jnp.float32)
                s = jnp.where(row_ids >= col_base + off, s, NEG)
                if has_kpm:
                    s = s + kpm_ref[0, j]                     # (1, TQkv) additive
                m_new = jnp.maximum(m_i, jnp.max(s, axis=-1, keepdims=True))
                alpha = jnp.exp(m_i - m_new)
                e = jnp.exp(s - m_new)
                l_new = alpha * l_i + jnp.sum(e, axis=-1, keepdims=True)
                vh = qkv_s[pl.ds(off, TQ), 2 * D + lo:2 * D + hi]
                acc_new = alpha * acc + jnp.dot(e.astype(jnp.bfloat16), vh,
                                                preferred_element_type=jnp.float32)
                return m_new, l_new, acc_new

            m0 = jnp.full((TQ, 1), -1e30, jnp.float32)
            l0 = jnp.zeros((TQ, 1), jnp.float32)
            a0 = jnp.zeros((TQ, dh), jnp.float32)
            _, l_f, acc_f = lax.fori_loop(0, n_kv, kv_body, (m0, l0, a0))
            ctx_heads.append(acc_f * pl.reciprocal(l_f, approx=True))
    else:
        # Weights / non-causal path: full-S scores per head, masks as additive bias.
        bias = None
        if causal:
            row = lax.broadcasted_iota(jnp.int32, (TQ, S), 0) + q0
            col = lax.broadcasted_iota(jnp.int32, (TQ, S), 1)
            bias = jnp.where(row >= col, jnp.float32(0.0), NEG)
        if has_attn:
            am = attn_ref[...]                                # streamed (TQ, S) tile
            bias = am if bias is None else bias + am
        if has_kpm:
            kp = kpm_ref[0]                                   # (1, S)
            bias = kp if bias is None else bias + kp

        if need_weights:
            attn_acc = jnp.zeros((TQ, S), jnp.float32)
        for h in range(H):
            lo, hi = h * dh, (h + 1) * dh
            qh = qkv_s[pl.ds(q0, TQ), lo:hi]                  # (TQ, dh) bf16
            kh = qkv_s[:, D + lo:D + hi]                      # (S, dh)  bf16
            vh = qkv_s[:, 2 * D + lo:2 * D + hi]              # (S, dh)  bf16
            s = lax.dot_general(qh, kh, (((1,), (1,)), ((), ())),
                                preferred_element_type=jnp.float32)
            if bias is not None:
                s = s + bias
            m = jnp.max(s, axis=-1, keepdims=True)
            e = jnp.exp(s - m)
            den = jnp.sum(e, axis=-1, keepdims=True)
            p = e * pl.reciprocal(den, approx=True)           # (TQ, S) f32
            if need_weights:
                attn_acc = attn_acc + p
            ctx_heads.append(jnp.dot(p.astype(jnp.bfloat16), vh,
                                     preferred_element_type=jnp.float32))

    ctx = jnp.concatenate(ctx_heads, axis=-1)                 # (TQ, D) f32
    out = jnp.dot(ctx.astype(jnp.bfloat16), wo_ref[...],
                  preferred_element_type=jnp.float32) + bo_ref[...]
    out_ref[0] = (x_tile + out).astype(out_ref.dtype)
    if need_weights:
        attnw_ref[0] = (attn_acc * (1.0 / H)).astype(attnw_ref.dtype)


def _pick_q_tile(S):
    # Cap at 128: bigger tiles do not help the MXU M dimension and blow VMEM on v7x.
    for t in (128, 64, 32, 16, 8):
        if S % t == 0:
            return t
    return S


def self_attention_layer(x, params, *, num_heads, key_padding_mask=None,
                         attn_mask=None, causal=False, eps=1e-5,
                         need_weights=True, q_tile=None):
    """Pallas-backed forward pass of SelfAttentionLayer (pre-LN MHA + residual).

    Args:
      x: (B, S, D) float32.
      params: dict with 'wqkv' (3D,D), 'bqkv' (3D,), 'wo' (D,D), 'bo' (D,),
              'gamma' (D,), 'beta' (D,).
      key_padding_mask: optional (B, S) bool (True = masked key) or float additive.
      attn_mask: optional (S, S) bool (True = masked) or float additive mask.
      causal: if True, the standard causal mask is generated in-kernel and
              attn_mask is ignored (no (S,S) mask is ever transferred).
      need_weights: True matches the PyTorch module (weights are returned);
              False enables the fast flash path (per-tile projection + causal
              kv-block skipping).

    Returns:
      (out (B,S,D), attn_weights (B,S,S) or None) - weights averaged over heads.
      Note: fully-masked query rows give uniform attention (additive -1e9) rather
      than PyTorch's NaN, and weights/QKV use bf16 MXU operands.
    """
    B, S, D = x.shape
    assert D % num_heads == 0
    dh = D // num_heads
    if q_tile is None:
        q_tile = _pick_q_tile(S)
    assert S % q_tile == 0
    n_q = S // q_tile

    NEG = jnp.float32(-1e9)
    has_kpm = key_padding_mask is not None
    has_attn = (attn_mask is not None) and (not causal)
    flash = causal and not need_weights          # fast path

    inputs = []
    in_specs = []

    if flash:
        inputs.append(x)
        in_specs.append(pl.BlockSpec((1, q_tile, D), lambda b, q: (b, q, 0)))
    else:
        inputs.append(x)
        in_specs.append(pl.BlockSpec((1, S, D), lambda b, q: (b, 0, 0)))

    if has_kpm:
        if key_padding_mask.dtype == jnp.bool_:
            kpm_add = jnp.where(key_padding_mask, NEG, 0.0).astype(jnp.float32)
        else:
            kpm_add = key_padding_mask.astype(jnp.float32)
        if flash:
            kpm_add = kpm_add.reshape(B, n_q, 1, q_tile)
            inputs.append(kpm_add)
            in_specs.append(pl.BlockSpec((1, n_q, 1, q_tile),
                                         lambda b, q: (b, 0, 0, 0)))
        else:
            kpm_add = kpm_add.reshape(B, 1, S)
            inputs.append(kpm_add)
            in_specs.append(pl.BlockSpec((1, 1, S), lambda b, q: (b, 0, 0)))

    if has_attn:
        if attn_mask.dtype == jnp.bool_:
            am = jnp.where(attn_mask, NEG, 0.0).astype(jnp.float32)
        else:
            am = attn_mask.astype(jnp.float32)
        inputs.append(am)
        # Streamed per query tile (never a resident (S,S) block).
        in_specs.append(pl.BlockSpec((q_tile, S), lambda b, q: (q, 0)))

    # Weights: MXU operands in bf16 (pre-transposed); fold the 1/sqrt(dh) score
    # scale into the Q projection rows so the kernel never scales scores.
    scale = 1.0 / float(dh) ** 0.5
    q_scale = jnp.concatenate([jnp.full((D,), scale, jnp.float32),
                               jnp.ones((2 * D,), jnp.float32)])
    wqkv = params["wqkv"].astype(jnp.float32) * q_scale[:, None]
    wqkv_t = wqkv.T.astype(jnp.bfloat16)                      # (D, 3D)
    bqkv = (params["bqkv"].astype(jnp.float32) * q_scale).reshape(1, 3 * D)
    wo_t = params["wo"].astype(jnp.float32).T.astype(jnp.bfloat16)   # (D, D)
    bo = params["bo"].astype(jnp.float32).reshape(1, D)
    gamma = params["gamma"].astype(jnp.float32).reshape(1, D)
    beta = params["beta"].astype(jnp.float32).reshape(1, D)

    inputs += [wqkv_t, bqkv, wo_t, bo, gamma, beta]
    in_specs += [
        pl.BlockSpec((D, 3 * D), lambda b, q: (0, 0)),
        pl.BlockSpec((1, 3 * D), lambda b, q: (0, 0)),
        pl.BlockSpec((D, D), lambda b, q: (0, 0)),
        pl.BlockSpec((1, D), lambda b, q: (0, 0)),
        pl.BlockSpec((1, D), lambda b, q: (0, 0)),
        pl.BlockSpec((1, D), lambda b, q: (0, 0)),
    ]

    out_shape = [jax.ShapeDtypeStruct((B, S, D), x.dtype)]
    out_specs = [pl.BlockSpec((1, q_tile, D), lambda b, q: (b, q, 0))]
    if need_weights:
        out_shape.append(jax.ShapeDtypeStruct((B, S, S), jnp.float32))
        out_specs.append(pl.BlockSpec((1, q_tile, S), lambda b, q: (b, q, 0)))

    kernel = functools.partial(
        _self_attn_kernel, num_heads=num_heads, eps=eps, q_tile=q_tile, n_q=n_q,
        causal=causal, has_kpm=has_kpm, has_attn=has_attn,
        need_weights=need_weights, flash=flash)

    # VMEM limit: derive from the device and leave headroom (v7x has 64 MiB/TC,
    # v5e/v6e have 128 MiB).
    try:
        vmem_cap = pltpu.get_tpu_info().vmem_capacity_bytes
    except Exception:
        vmem_cap = 64 * 1024 * 1024
    vmem_limit = int(vmem_cap * 0.85)

    # Advisory cost estimate for XLA's scheduler around the custom call.
    attn_flops = (2 if flash else 4) * B * S * S * D
    cost = pl.CostEstimate(
        flops=int(8 * B * S * D * D + attn_flops),
        transcendentals=int(B * num_heads * S * S),
        bytes_accessed=int(2 * B * S * D * 4 + 8 * D * D
                           + (B * S * S * 4 if need_weights else 0)
                           + (S * S * 4 if has_attn else 0)))

    results = pl.pallas_call(
        kernel,
        out_shape=tuple(out_shape),
        grid=(B, n_q),
        in_specs=in_specs,
        out_specs=tuple(out_specs),
        scratch_shapes=[pltpu.VMEM((S, 3 * D), jnp.bfloat16)],
        compiler_params=pltpu.CompilerParams(
            dimension_semantics=("parallel", "arbitrary"),
            vmem_limit_bytes=vmem_limit),
        cost_estimate=cost,
    )(*inputs)

    if need_weights:
        out, attnw = results
        return out, attnw
    (out,) = results
    return out, None


def _ref_forward(x, params, num_heads, add_mask, eps=1e-5):
    """Pure-JAX reference matching PyTorch nn.MultiheadAttention semantics."""
    B, S, D = x.shape
    dh = D // num_heads
    mean = x.mean(-1, keepdims=True)
    var = ((x - mean) ** 2).mean(-1, keepdims=True)
    ln = (x - mean) / jnp.sqrt(var + eps) * params["gamma"] + params["beta"]
    qkv = ln @ params["wqkv"].T + params["bqkv"]
    q, k, v = jnp.split(qkv, 3, axis=-1)

    def heads(t):
        return t.reshape(B, S, num_heads, dh).transpose(0, 2, 1, 3)

    qh, kh, vh = heads(q), heads(k), heads(v)
    scores = jnp.einsum("bhqd,bhkd->bhqk", qh / jnp.sqrt(dh), kh)
    scores = scores + add_mask[:, None, :, :]
    p = jax.nn.softmax(scores, axis=-1)
    ctx = jnp.einsum("bhqk,bhkd->bhqd", p, vh).transpose(0, 2, 1, 3).reshape(B, S, D)
    out = ctx @ params["wo"].T + params["bo"]
    return x + out, p.mean(axis=1)


if __name__ == "__main__":
    B, S, D, H = 2, 8, 32, 4

    key = jax.random.PRNGKey(0)
    kx, k1, k2, k3, k4 = jax.random.split(key, 5)

    x = jax.random.normal(kx, (B, S, D), dtype=jnp.float32)

    params = {
        "wqkv": 0.05 * jax.random.normal(k1, (3 * D, D), dtype=jnp.float32),
        "bqkv": 0.01 * jax.random.normal(k2, (3 * D,), dtype=jnp.float32),
        "wo": 0.05 * jax.random.normal(k3, (D, D), dtype=jnp.float32),
        "bo": 0.01 * jax.random.normal(k4, (D,), dtype=jnp.float32),
        "gamma": jnp.ones((D,), jnp.float32),
        "beta": jnp.zeros((D,), jnp.float32),
    }

    # Standard causal mask (True = masked), same convention as torch bool attn_mask.
    causal_bool = jnp.triu(jnp.ones((S, S), dtype=jnp.bool_), k=1)

    # 1) Causal mask generated in-kernel; weights returned (module semantics).
    out1, w1 = self_attention_layer(x, params, num_heads=H, causal=True)
    out1 = jax.block_until_ready(out1)
    w1 = jax.block_until_ready(w1)

    add1 = jnp.where(causal_bool, jnp.float32(-1e9), 0.0)[None].repeat(B, axis=0)
    ref_out1, ref_w1 = _ref_forward(x, params, H, add1)
    assert out1.shape == (B, S, D) and w1.shape == (B, S, S)
    assert jnp.allclose(out1, ref_out1, atol=1e-2, rtol=1e-2)
    assert jnp.allclose(w1, ref_w1, atol=1e-2, rtol=1e-2)
    # Causality: attention weights above the diagonal must be exactly ~0.
    assert float(jnp.max(jnp.abs(jnp.where(causal_bool[None], w1, 0.0)))) < 1e-6

    # 2) Explicit bool attn_mask + key_padding_mask path (mask streamed per tile).
    kpm = jnp.zeros((B, S), dtype=jnp.bool_).at[1, -2:].set(True)
    out2, w2 = self_attention_layer(x, params, num_heads=H,
                                    attn_mask=causal_bool, key_padding_mask=kpm)
    out2 = jax.block_until_ready(out2)
    add2 = add1 + jnp.where(kpm, jnp.float32(-1e9), 0.0)[:, None, :]
    ref_out2, ref_w2 = _ref_forward(x, params, H, add2)
    assert jnp.allclose(out2, ref_out2, atol=1e-2, rtol=1e-2)
    assert jnp.allclose(w2, ref_w2, atol=1e-2, rtol=1e-2)

    # 3) Fast path: causal + need_weights=False (per-tile projection, flash
    #    kv-block loop, streamed x, no (S,S) work at all).
    out3, w3 = self_attention_layer(x, params, num_heads=H, causal=True,
                                    need_weights=False)
    out3 = jax.block_until_ready(out3)
    assert w3 is None
    assert jnp.allclose(out3, out1, atol=1e-3, rtol=1e-3)

    # 4) Fast path with a key_padding_mask as well.
    out4, _ = self_attention_layer(x, params, num_heads=H, causal=True,
                                   key_padding_mask=kpm, need_weights=False)
    out4 = jax.block_until_ready(out4)
    ref_out4, _ = _ref_forward(x, params, H, add2)
    assert jnp.allclose(out4, ref_out4, atol=1e-2, rtol=1e-2)

    print("KERNEL_OK")
</pallas_src>

<mosaic_0001>
module attributes {stable_mosaic.version = 11 : i64} {
  func.func @_self_attn_kernel(%arg0: i32, %arg1: i32, %arg2: memref<1x8x32xf32, #tpu.memory_space<vmem>>, %arg3: memref<32x96xbf16, #tpu.memory_space<vmem>>, %arg4: memref<1x96xf32, #tpu.memory_space<vmem>>, %arg5: memref<32x32xbf16, #tpu.memory_space<vmem>>, %arg6: memref<1x32xf32, #tpu.memory_space<vmem>>, %arg7: memref<1x32xf32, #tpu.memory_space<vmem>>, %arg8: memref<1x32xf32, #tpu.memory_space<vmem>>, %arg9: memref<1x8x32xf32, #tpu.memory_space<vmem>>, %arg10: memref<1x8x8xf32, #tpu.memory_space<vmem>>, %arg11: memref<8x96xbf16, #tpu.memory_space<vmem>>) attributes {dimension_semantics = [#tpu.dimension_semantics<parallel>, #tpu.dimension_semantics<arbitrary>], iteration_bounds = array<i64: 2, 1>, scalar_prefetch = 0 : i64, scratch_operands = 1 : i64, tpu.core_type = #tpu.core_type<tc>, window_params = [{transform_indices = @transform_0, window_bounds = array<i64: 1, 8, 32>}, {pipeline_mode = #tpu.pipeline_mode<synchronous>, transform_indices = @transform_1, window_bounds = array<i64: 32, 96>}, {pipeline_mode = #tpu.pipeline_mode<synchronous>, transform_indices = @transform_2, window_bounds = array<i64: 1, 96>}, {pipeline_mode = #tpu.pipeline_mode<synchronous>, transform_indices = @transform_3, window_bounds = array<i64: 32, 32>}, {pipeline_mode = #tpu.pipeline_mode<synchronous>, transform_indices = @transform_4, window_bounds = array<i64: 1, 32>}, {pipeline_mode = #tpu.pipeline_mode<synchronous>, transform_indices = @transform_5, window_bounds = array<i64: 1, 32>}, {pipeline_mode = #tpu.pipeline_mode<synchronous>, transform_indices = @transform_6, window_bounds = array<i64: 1, 32>}, {transform_indices = @transform_7, window_bounds = array<i64: 1, 8, 32>}, {transform_indices = @transform_8, window_bounds = array<i64: 1, 8, 8>}]} {
    %c8_i32 = arith.constant 8 : i32
    %0 = arith.muli %arg1, %c8_i32 : i32
    %1 = tpu.assume_multiple %0, 8 : i32
    %c0_i32 = arith.constant 0 : i32
    %2 = arith.cmpi eq, %arg1, %c0_i32 : i32
    %3 = arith.extui %2 : i1 to i32
    %c0_i32_0 = arith.constant 0 : i32
    %4 = arith.cmpi ne, %3, %c0_i32_0 : i32
    scf.if %4 {
      %c0_i32_41 = arith.constant 0 : i32
      %c1_i32 = arith.constant 1 : i32
      %109 = arith.muli %c0_i32_41, %c1_i32 : i32
      %c0_i32_42 = arith.constant 0 : i32
      %110 = arith.addi %c0_i32_42, %109 : i32
      %c8_i32_43 = arith.constant 8 : i32
      %111 = arith.muli %110, %c8_i32_43 : i32
      %112 = tpu.assume_multiple %111, 8 : i32
      %c0_44 = arith.constant 0 : index
      %113 = arith.index_cast %112 : i32 to index
      %c0_45 = arith.constant 0 : index
      %114 = vector.load %arg2[%c0_44, %113, %c0_45] : memref<1x8x32xf32, #tpu.memory_space<vmem>>, vector<1x8x32xf32>
      %115 = vector.shape_cast %114 : vector<1x8x32xf32> to vector<8x32xf32>
      %cst_46 = arith.constant dense<0.000000e+00> : vector<8xf32>
      %116 = vector.multi_reduction <add>, %115, %cst_46 [1] : vector<8x32xf32> to vector<8xf32>
      %117 = vector.shape_cast %116 : vector<8xf32> to vector<8x1xf32>
      %cst_47 = arith.constant 3.200000e+01 : f32
      %118 = vector.broadcast %cst_47 : f32 to vector<8x1xf32>
      %119 = arith.divf %117, %118 : vector<8x1xf32>
      %120 = vector.broadcast %119 : vector<8x1xf32> to vector<8x32xf32>
      %121 = arith.subf %115, %120 : vector<8x32xf32>
      %122 = arith.mulf %121, %121 : vector<8x32xf32>
      %cst_48 = arith.constant dense<0.000000e+00> : vector<8xf32>
      %123 = vector.multi_reduction <add>, %122, %cst_48 [1] : vector<8x32xf32> to vector<8xf32>
      %124 = vector.shape_cast %123 : vector<8xf32> to vector<8x1xf32>
      %cst_49 = arith.constant 3.200000e+01 : f32
      %125 = vector.broadcast %cst_49 : f32 to vector<8x1xf32>
      %126 = arith.divf %124, %125 : vector<8x1xf32>
      %127 = vector.broadcast %119 : vector<8x1xf32> to vector<8x32xf32>
      %128 = arith.subf %115, %127 : vector<8x32xf32>
      %cst_50 = arith.constant 9.99999974E-6 : f32
      %129 = vector.broadcast %cst_50 : f32 to vector<8x1xf32>
      %130 = arith.addf %126, %129 : vector<8x1xf32>
      %131 = math.rsqrt %130 : vector<8x1xf32>
      %132 = vector.broadcast %131 : vector<8x1xf32> to vector<8x32xf32>
      %133 = arith.mulf %128, %132 : vector<8x32xf32>
      %c0_51 = arith.constant 0 : index
      %c0_52 = arith.constant 0 : index
      %134 = vector.load %arg7[%c0_51, %c0_52] : memref<1x32xf32, #tpu.memory_space<vmem>>, vector<1x32xf32>
      %135 = vector.broadcast %134 : vector<1x32xf32> to vector<8x32xf32>
      %136 = arith.mulf %133, %135 : vector<8x32xf32>
      %c0_53 = arith.constant 0 : index
      %c0_54 = arith.constant 0 : index
      %137 = vector.load %arg8[%c0_53, %c0_54] : memref<1x32xf32, #tpu.memory_space<vmem>>, vector<1x32xf32>
      %138 = vector.broadcast %137 : vector<1x32xf32> to vector<8x32xf32>
      %139 = arith.addf %136, %138 : vector<8x32xf32>
      %140 = arith.truncf %139 : vector<8x32xf32> to vector<8x32xbf16>
      %c0_55 = arith.constant 0 : index
      %c0_56 = arith.constant 0 : index
      %141 = vector.load %arg3[%c0_55, %c0_56] : memref<32x96xbf16, #tpu.memory_space<vmem>>, vector<32x96xbf16>
      %cst_57 = arith.constant dense<0.000000e+00> : vector<8x96xf32>
      %142 = tpu.matmul %140, %141, %cst_57 {dimension_numbers = #tpu.dot_dimension_numbers<[1], [0], [0], [1], [0, 0, 1, 1], [], []>} : vector<8x32xbf16>, vector<32x96xbf16>, vector<8x96xf32> -> vector<8x96xf32>
      %c0_58 = arith.constant 0 : index
      %c0_59 = arith.constant 0 : index
      %143 = vector.load %arg4[%c0_58, %c0_59] : memref<1x96xf32, #tpu.memory_space<vmem>>, vector<1x96xf32>
      %144 = vector.broadcast %143 : vector<1x96xf32> to vector<8x96xf32>
      %145 = arith.addf %142, %144 : vector<8x96xf32>
      %146 = arith.truncf %145 : vector<8x96xf32> to vector<8x96xbf16>
      %147 = arith.index_cast %112 : i32 to index
      %c0_60 = arith.constant 0 : index
      %148 = vector.load %arg11[%147, %c0_60] : memref<8x96xbf16, #tpu.memory_space<vmem>>, vector<8x96xbf16>
      tpu.vector_store %arg11[%147, %c0_60], %146 {strides = array<i32>} : memref<8x96xbf16, #tpu.memory_space<vmem>>, vector<8x96xbf16>,
      %c1_i32_61 = arith.constant 1 : i32
    } else {
    }
    %c0 = arith.constant 0 : index
    %5 = arith.index_cast %1 : i32 to index
    %c0_1 = arith.constant 0 : index
    %6 = vector.load %arg2[%c0, %5, %c0_1] : memref<1x8x32xf32, #tpu.memory_space<vmem>>, vector<1x8x32xf32>
    %7 = vector.shape_cast %6 : vector<1x8x32xf32> to vector<8x32xf32>
    %8 = tpu.iota {dimensions = array<i32: 0>} : vector<8x8xi32>
    %9 = vector.broadcast %1 : i32 to vector<8x8xi32>
    %10 = arith.addi %8, %9 : vector<8x8xi32>
    %11 = tpu.iota {dimensions = array<i32: 1>} : vector<8x8xi32>
    %12 = arith.cmpi sge, %10, %11 : vector<8x8xi32>
    %cst = arith.constant 0.000000e+00 : f32
    %cst_2 = arith.constant -1.000000e+09 : f32
    %13 = vector.broadcast %cst : f32 to vector<8x8xf32>
    %14 = vector.broadcast %cst_2 : f32 to vector<8x8xf32>
    %15 = arith.select %12, %13, %14 : vector<8x8xi1>, vector<8x8xf32>
    %cst_3 = arith.constant 0.000000e+00 : f32
    %16 = vector.broadcast %cst_3 : f32 to vector<8x8xf32>
    %17 = arith.index_cast %1 : i32 to index
    %c0_4 = arith.constant 0 : index
    %18 = vector.load %arg11[%17, %c0_4] : memref<8x96xbf16, #tpu.memory_space<vmem>>, vector<8x8xbf16>
    %c0_5 = arith.constant 0 : index
    %c32 = arith.constant 32 : index
    %19 = vector.load %arg11[%c0_5, %c32] : memref<8x96xbf16, #tpu.memory_space<vmem>>, vector<8x8xbf16>
    %c0_6 = arith.constant 0 : index
    %c64 = arith.constant 64 : index
    %20 = vector.load %arg11[%c0_6, %c64] : memref<8x96xbf16, #tpu.memory_space<vmem>>, vector<8x8xbf16>
    %cst_7 = arith.constant dense<0.000000e+00> : vector<8x8xf32>
    %21 = tpu.matmul %18, %19, %cst_7 {dimension_numbers = #tpu.dot_dimension_numbers<[1], [1], [0], [0], [0, 0, 1, 0], [], []>} : vector<8x8xbf16>, vector<8x8xbf16>, vector<8x8xf32> -> vector<8x8xf32>
    %22 = arith.addf %21, %15 : vector<8x8xf32>
    %cst_8 = arith.constant dense<0xFF800000> : vector<8xf32>
    %23 = vector.multi_reduction <maximumf>, %22, %cst_8 [1] : vector<8x8xf32> to vector<8xf32>
    %24 = vector.shape_cast %23 : vector<8xf32> to vector<8x1xf32>
    %25 = vector.broadcast %24 : vector<8x1xf32> to vector<8x8xf32>
    %26 = arith.subf %22, %25 : vector<8x8xf32>
    %27 = math.exp %26 : vector<8x8xf32>
    %cst_9 = arith.constant dense<0.000000e+00> : vector<8xf32>
    %28 = vector.multi_reduction <add>, %27, %cst_9 [1] : vector<8x8xf32> to vector<8xf32>
    %29 = vector.shape_cast %28 : vector<8xf32> to vector<8x1xf32>
    %30 = tpu.reciprocal %29 {approx = true} : vector<8x1xf32> -> vector<8x1xf32>
    %31 = vector.broadcast %30 : vector<8x1xf32> to vector<8x8xf32>
    %32 = arith.mulf %27, %31 : vector<8x8xf32>
    %33 = arith.addf %16, %32 : vector<8x8xf32>
    %34 = arith.truncf %32 : vector<8x8xf32> to vector<8x8xbf16>
    %cst_10 = arith.constant dense<0.000000e+00> : vector<8x8xf32>
    %35 = tpu.matmul %34, %20, %cst_10 {dimension_numbers = #tpu.dot_dimension_numbers<[1], [0], [0], [1], [0, 0, 1, 1], [], []>} : vector<8x8xbf16>, vector<8x8xbf16>, vector<8x8xf32> -> vector<8x8xf32>
    %36 = arith.index_cast %1 : i32 to index
    %c8 = arith.constant 8 : index
    %37 = vector.load %arg11[%36, %c8] : memref<8x96xbf16, #tpu.memory_space<vmem>>, vector<8x8xbf16>
    %c0_11 = arith.constant 0 : index
    %c40 = arith.constant 40 : index
    %38 = vector.load %arg11[%c0_11, %c40] : memref<8x96xbf16, #tpu.memory_space<vmem>>, vector<8x8xbf16>
    %c0_12 = arith.constant 0 : index
    %c72 = arith.constant 72 : index
    %39 = vector.load %arg11[%c0_12, %c72] : memref<8x96xbf16, #tpu.memory_space<vmem>>, vector<8x8xbf16>
    %cst_13 = arith.constant dense<0.000000e+00> : vector<8x8xf32>
    %40 = tpu.matmul %37, %38, %cst_13 {dimension_numbers = #tpu.dot_dimension_numbers<[1], [1], [0], [0], [0, 0, 1, 0], [], []>} : vector<8x8xbf16>, vector<8x8xbf16>, vector<8x8xf32> -> vector<8x8xf32>
    %41 = arith.addf %40, %15 : vector<8x8xf32>
    %cst_14 = arith.constant dense<0xFF800000> : vector<8xf32>
    %42 = vector.multi_reduction <maximumf>, %41, %cst_14 [1] : vector<8x8xf32> to vector<8xf32>
    %43 = vector.shape_cast %42 : vector<8xf32> to vector<8x1xf32>
    %44 = vector.broadcast %43 : vector<8x1xf32> to vector<8x8xf32>
    %45 = arith.subf %41, %44 : vector<8x8xf32>
    %46 = math.exp %45 : vector<8x8xf32>
    %cst_15 = arith.constant dense<0.000000e+00> : vector<8xf32>
    %47 = vector.multi_reduction <add>, %46, %cst_15 [1] : vector<8x8xf32> to vector<8xf32>
    %48 = vector.shape_cast %47 : vector<8xf32> to vector<8x1xf32>
    %49 = tpu.reciprocal %48 {approx = true} : vector<8x1xf32> -> vector<8x1xf32>
    %50 = vector.broadcast %49 : vector<8x1xf32> to vector<8x8xf32>
    %51 = arith.mulf %46, %50 : vector<8x8xf32>
    %52 = arith.addf %33, %51 : vector<8x8xf32>
    %53 = arith.truncf %51 : vector<8x8xf32> to vector<8x8xbf16>
    %cst_16 = arith.constant dense<0.000000e+00> : vector<8x8xf32>
    %54 = tpu.matmul %53, %39, %cst_16 {dimension_numbers = #tpu.dot_dimension_numbers<[1], [0], [0], [1], [0, 0, 1, 1], [], []>} : vector<8x8xbf16>, vector<8x8xbf16>, vector<8x8xf32> -> vector<8x8xf32>
    %55 = arith.index_cast %1 : i32 to index
    %c16 = arith.constant 16 : index
    %56 = vector.load %arg11[%55, %c16] : memref<8x96xbf16, #tpu.memory_space<vmem>>, vector<8x8xbf16>
    %c0_17 = arith.constant 0 : index
    %c48 = arith.constant 48 : index
    %57 = vector.load %arg11[%c0_17, %c48] : memref<8x96xbf16, #tpu.memory_space<vmem>>, vector<8x8xbf16>
    %c0_18 = arith.constant 0 : index
    %c80 = arith.constant 80 : index
    %58 = vector.load %arg11[%c0_18, %c80] : memref<8x96xbf16, #tpu.memory_space<vmem>>, vector<8x8xbf16>
    %cst_19 = arith.constant dense<0.000000e+00> : vector<8x8xf32>
    %59 = tpu.matmul %56, %57, %cst_19 {dimension_numbers = #tpu.dot_dimension_numbers<[1], [1], [0], [0], [0, 0, 1, 0], [], []>} : vector<8x8xbf16>, vector<8x8xbf16>, vector<8x8xf32> -> vector<8x8xf32>
    %60 = arith.addf %59, %15 : vector<8x8xf32>
    %cst_20 = arith.constant dense<0xFF800000> : vector<8xf32>
    %61 = vector.multi_reduction <maximumf>, %60, %cst_20 [1] : vector<8x8xf32> to vector<8xf32>
    %62 = vector.shape_cast %61 : vector<8xf32> to vector<8x1xf32>
    %63 = vector.broadcast %62 : vector<8x1xf32> to vector<8x8xf32>
    %64 = arith.subf %60, %63 : vector<8x8xf32>
    %65 = math.exp %64 : vector<8x8xf32>
    %cst_21 = arith.constant dense<0.000000e+00> : vector<8xf32>
    %66 = vector.multi_reduction <add>, %65, %cst_21 [1] : vector<8x8xf32> to vector<8xf32>
    %67 = vector.shape_cast %66 : vector<8xf32> to vector<8x1xf32>
    %68 = tpu.reciprocal %67 {approx = true} : vector<8x1xf32> -> vector<8x1xf32>
    %69 = vector.broadcast %68 : vector<8x1xf32> to vector<8x8xf32>
    %70 = arith.mulf %65, %69 : vector<8x8xf32>
    %71 = arith.addf %52, %70 : vector<8x8xf32>
    %72 = arith.truncf %70 : vector<8x8xf32> to vector<8x8xbf16>
    %cst_22 = arith.constant dense<0.000000e+00> : vector<8x8xf32>
    %73 = tpu.matmul %72, %58, %cst_22 {dimension_numbers = #tpu.dot_dimension_numbers<[1], [0], [0], [1], [0, 0, 1, 1], [], []>} : vector<8x8xbf16>, vector<8x8xbf16>, vector<8x8xf32> -> vector<8x8xf32>
    %74 = arith.index_cast %1 : i32 to index
    %c24 = arith.constant 24 : index
    %75 = vector.load %arg11[%74, %c24] : memref<8x96xbf16, #tpu.memory_space<vmem>>, vector<8x8xbf16>
    %c0_23 = arith.constant 0 : index
    %c56 = arith.constant 56 : index
    %76 = vector.load %arg11[%c0_23, %c56] : memref<8x96xbf16, #tpu.memory_space<vmem>>, vector<8x8xbf16>
    %c0_24 = arith.constant 0 : index
    %c88 = arith.constant 88 : index
    %77 = vector.load %arg11[%c0_24, %c88] : memref<8x96xbf16, #tpu.memory_space<vmem>>, vector<8x8xbf16>
    %cst_25 = arith.constant dense<0.000000e+00> : vector<8x8xf32>
    %78 = tpu.matmul %75, %76, %cst_25 {dimension_numbers = #tpu.dot_dimension_numbers<[1], [1], [0], [0], [0, 0, 1, 0], [], []>} : vector<8x8xbf16>, vector<8x8xbf16>, vector<8x8xf32> -> vector<8x8xf32>
    %79 = arith.addf %78, %15 : vector<8x8xf32>
    %cst_26 = arith.constant dense<0xFF800000> : vector<8xf32>
    %80 = vector.multi_reduction <maximumf>, %79, %cst_26 [1] : vector<8x8xf32> to vector<8xf32>
    %81 = vector.shape_cast %80 : vector<8xf32> to vector<8x1xf32>
    %82 = vector.broadcast %81 : vector<8x1xf32> to vector<8x8xf32>
    %83 = arith.subf %79, %82 : vector<8x8xf32>
    %84 = math.exp %83 : vector<8x8xf32>
    %cst_27 = arith.constant dense<0.000000e+00> : vector<8xf32>
    %85 = vector.multi_reduction <add>, %84, %cst_27 [1] : vector<8x8xf32> to vector<8xf32>
    %86 = vector.shape_cast %85 : vector<8xf32> to vector<8x1xf32>
    %87 = tpu.reciprocal %86 {approx = true} : vector<8x1xf32> -> vector<8x1xf32>
    %88 = vector.broadcast %87 : vector<8x1xf32> to vector<8x8xf32>
    %89 = arith.mulf %84, %88 : vector<8x8xf32>
    %90 = arith.addf %71, %89 : vector<8x8xf32>
    %91 = arith.truncf %89 : vector<8x8xf32> to vector<8x8xbf16>
    %cst_28 = arith.constant dense<0.000000e+00> : vector<8x8xf32>
    %92 = tpu.matmul %91, %77, %cst_28 {dimension_numbers = #tpu.dot_dimension_numbers<[1], [0], [0], [1], [0, 0, 1, 1], [], []>} : vector<8x8xbf16>, vector<8x8xbf16>, vector<8x8xf32> -> vector<8x8xf32>
    %93 = tpu.concatenate %35, %54, %73, %92 in 1 : vector<8x8xf32>, vector<8x8xf32>, vector<8x8xf32>, vector<8x8xf32> -> vector<8x32xf32>
    %94 = arith.truncf %93 : vector<8x32xf32> to vector<8x32xbf16>
    %c0_29 = arith.constant 0 : index
    %c0_30 = arith.constant 0 : index
    %95 = vector.load %arg5[%c0_29, %c0_30] : memref<32x32xbf16, #tpu.memory_space<vmem>>, vector<32x32xbf16>
    %cst_31 = arith.constant dense<0.000000e+00> : vector<8x32xf32>
    %96 = tpu.matmul %94, %95, %cst_31 {dimension_numbers = #tpu.dot_dimension_numbers<[1], [0], [0], [1], [0, 0, 1, 1], [], []>} : vector<8x32xbf16>, vector<32x32xbf16>, vector<8x32xf32> -> vector<8x32xf32>
    %c0_32 = arith.constant 0 : index
    %c0_33 = arith.constant 0 : index
    %97 = vector.load %arg6[%c0_32, %c0_33] : memref<1x32xf32, #tpu.memory_space<vmem>>, vector<1x32xf32>
    %98 = vector.broadcast %97 : vector<1x32xf32> to vector<8x32xf32>
    %99 = arith.addf %96, %98 : vector<8x32xf32>
    %100 = arith.addf %7, %99 : vector<8x32xf32>
    %c0_34 = arith.constant 0 : index
    %c0_35 = arith.constant 0 : index
    %c0_36 = arith.constant 0 : index
    %101 = vector.load %arg9[%c0_34, %c0_35, %c0_36] : memref<1x8x32xf32, #tpu.memory_space<vmem>>, vector<1x8x32xf32>
    %102 = vector.shape_cast %101 : vector<1x8x32xf32> to vector<8x32xf32>
    %103 = vector.shape_cast %100 : vector<8x32xf32> to vector<1x8x32xf32>
    tpu.vector_store %arg9[%c0_34, %c0_35, %c0_36], %103 {strides = array<i32>} : memref<1x8x32xf32, #tpu.memory_space<vmem>>, vector<1x8x32xf32>,
    %cst_37 = arith.constant 2.500000e-01 : f32
    %104 = vector.broadcast %cst_37 : f32 to vector<8x8xf32>
    %105 = arith.mulf %90, %104 : vector<8x8xf32>
    %c0_38 = arith.constant 0 : index
    %c0_39 = arith.constant 0 : index
    %c0_40 = arith.constant 0 : index
    %106 = vector.load %arg10[%c0_38, %c0_39, %c0_40] : memref<1x8x8xf32, #tpu.memory_space<vmem>>, vector<1x8x8xf32>
    %107 = vector.shape_cast %106 : vector<1x8x8xf32> to vector<8x8xf32>
    %108 = vector.shape_cast %105 : vector<8x8xf32> to vector<1x8x8xf32>
    tpu.vector_store %arg10[%c0_38, %c0_39, %c0_40], %108 {strides = array<i32>} : memref<1x8x8xf32, #tpu.memory_space<vmem>>, vector<1x8x8xf32>,
    return
  }
  func.func @transform_0(%arg0: i32, %arg1: i32) -> (i32, i32, i32) {
    %c0_i32 = arith.constant 0 : i32
    %c0_i32_0 = arith.constant 0 : i32
    %c0_i32_1 = arith.constant 0 : i32
    return %arg0, %c0_i32, %c0_i32_0 : i32, i32, i32
  }
  func.func @transform_1(%arg0: i32, %arg1: i32) -> (i32, i32) {
    %c0_i32 = arith.constant 0 : i32
    %c0_i32_0 = arith.constant 0 : i32
    %c0_i32_1 = arith.constant 0 : i32
    return %c0_i32, %c0_i32_0 : i32, i32
  }
  func.func @transform_2(%arg0: i32, %arg1: i32) -> (i32, i32) {
    %c0_i32 = arith.constant 0 : i32
    %c0_i32_0 = arith.constant 0 : i32
    %c0_i32_1 = arith.constant 0 : i32
    return %c0_i32, %c0_i32_0 : i32, i32
  }
  func.func @transform_3(%arg0: i32, %arg1: i32) -> (i32, i32) {
    %c0_i32 = arith.constant 0 : i32
    %c0_i32_0 = arith.constant 0 : i32
    %c0_i32_1 = arith.constant 0 : i32
    return %c0_i32, %c0_i32_0 : i32, i32
  }
  func.func @transform_4(%arg0: i32, %arg1: i32) -> (i32, i32) {
    %c0_i32 = arith.constant 0 : i32
    %c0_i32_0 = arith.constant 0 : i32
    %c0_i32_1 = arith.constant 0 : i32
    return %c0_i32, %c0_i32_0 : i32, i32
  }
  func.func @transform_5(%arg0: i32, %arg1: i32) -> (i32, i32) {
    %c0_i32 = arith.constant 0 : i32
    %c0_i32_0 = arith.constant 0 : i32
    %c0_i32_1 = arith.constant 0 : i32
    return %c0_i32, %c0_i32_0 : i32, i32
  }
  func.func @transform_6(%arg0: i32, %arg1: i32) -> (i32, i32) {
    %c0_i32 = arith.constant 0 : i32
    %c0_i32_0 = arith.constant 0 : i32
    %c0_i32_1 = arith.constant 0 : i32
    return %c0_i32, %c0_i32_0 : i32, i32
  }
  func.func @transform_7(%arg0: i32, %arg1: i32) -> (i32, i32, i32) {
    %c0_i32 = arith.constant 0 : i32
    %c0_i32_0 = arith.constant 0 : i32
    return %arg0, %arg1, %c0_i32 : i32, i32, i32
  }
  func.func @transform_8(%arg0: i32, %arg1: i32) -> (i32, i32, i32) {
    %c0_i32 = arith.constant 0 : i32
    %c0_i32_0 = arith.constant 0 : i32
    return %arg0, %arg1, %c0_i32 : i32, i32, i32
  }
}

</mosaic_0001>

<bundles_post_ra>
// kernel: tpu_custom_call.1
= control target key start
LH: loop header
LB: loop body
LE: loop exit
PB: predicated region body
PF: predicated region fallthrough
CT: control target
= control target key end

     0   :  { %s2036_s0 = inlined_call_operand.hbm [shape: f32[2,8,32], index: 0, kind: input, shape index: {}]   ;;  %s2037_s1 = inlined_call_operand.hbm [shape: bf16[32,96], index: 1, kind: input, shape index: {}]   ;;  %s2038_s2 = inlined_call_operand.vmem [shape: f32[1,96], index: 2, kind: input, shape index: {}]   ;;  %s2039_s3 = inlined_call_operand.hbm [shape: bf16[32,32], index: 3, kind: input, shape index: {}]   ;;  %s2040_s4 = inlined_call_operand.vmem [shape: f32[1,32], index: 4, kind: input, shape index: {}]   ;;  %s2041_s5 = inlined_call_operand.vmem [shape: f32[1,32], index: 5, kind: input, shape index: {}]   ;;  %s2042_s6 = inlined_call_operand.vmem [shape: f32[1,32], index: 6, kind: input, shape index: {}]   ;;  %s2043_s7 = inlined_call_operand.hbm [shape: f32[2,8,32], index: 7, kind: output, shape index: {0}]   ;;  %s2044_s8 = inlined_call_operand.hbm [shape: f32[2,8,8], index: 8, kind: output, shape index: {1}]  }
   0x1   :  { %2050 = sst [smem:[#allocation18_spill]] %s2037_s1 }
   0x2   :  { %2051 = sst [smem:[#allocation19_spill]] %s2039_s3 }
   0x3   :  { %14 = vsyncpa [#allocation4], 0 }
   0x4   :  { %16 = vsyncpa [#allocation4 + $0x1], 0 }
   0x5   :  { %17 = vsyncpa [#allocation7], 0 }
   0x6   :  { %18 = vsyncpa [#allocation5], 0 }
   0x7   :  { %20 = vsyncpa [#allocation5 + $0x1], 0 }
   0x8   :  { %21 = vsyncpa [#allocation11], 0 }
   0x9   :  { %23 = vsyncpa [#allocation11 + $0x1], 0  ;;  %s1731_s27 = smov 0   ;;  %s1733_s28 = smov 0  }
   0xa   :  { %s1735_s29 = smov 0   ;;  %s1737_s30 = smov 0  }
   0xb   :  { %s1739_s9 = smov 0   ;;  %s1741_s10 = smov 0  }
   0xc LB: > { %2052 = sst [smem:[#allocation16_spill]] %s1656_s9  ;;  %s1209_s11 = sadd.s32 4294967295, %s1660_s10   ;;  %s1660_s10 = sphi %s1741_s10, %s29_s10   ;;  %s1656_s9 = sphi %s1739_s9, %s2069_s9   ;;  %s1652_s30 = sphi %s1737_s30, %s2068_s30   ;;  %s1648_s29 = sphi %s1735_s29, %s2072_s29   ;;  %s1644_s28 = sphi %s1733_s28, %s2071_s28   ;;  %s1640_s27 = sphi %s1731_s27, %s2070_s27  }
   0xd   : > { %s1210_s12 = sadd.s32 4294967294, %s1660_s10   ;;  %p61_p0 = scmp.ne.s32.totalorder %s1644_s28, %s1640_s27 }
   0xe   : > { %p1765_p1 = scmp.eq.s32.totalorder %s1209_s11, 0  ;;  %p1769_p2 = scmp.eq.s32.totalorder %s1209_s11, 1 }
   0xf   : > { %p219_p3 = scmp.eq.s32.totalorder %s1210_s12, 1  ;;  %p1211_p5 = scmp.ge.s32.totalorder %s1660_s10, 1 }
  0x10   : > { %s2053_s13 = scalar_select %p1765_p1, 1, 0 }
  0x11   : > { %p1775_p4 = por %p1765_p1, %p61_p0  ;;  %p1780_p6 = por %p219_p3, %p61_p0 }
  0x12   : > { %p254_p7 = scmp.lt.s32.totalorder %s1660_s10, 3  ;;  %s1662_s18 = smov [#allocation6]  }
  0x13   : > { %s2055_s15 = scalar_select %p1775_p4, 1, 0 }
  0x14   : > { %s2056_s16 = scalar_select %p1780_p6, 1, 0 }
  0x15   : > { %p1785_p8 = pnand %p1211_p5, %p254_p7  ;;  %s266_s19 = sshll.u32 %s1662_s18, 4  ;;  %s267_s19 = int_to_ptr.vmem [resolvable:$true] %s266_s19 }
  0x16   : > { %s1663_s21 = smov [#allocation8]   ;;  %s1477_s23 = scalar_lea.vmem %s267_s19, 256 }
  0x17   : > { %p1349_p9 = pneg %p1785_p8  ;;  %s282_s22 = sshll.u32 %s1663_s21, 4  ;;  %s283_s22 = int_to_ptr.vmem [resolvable:$true] %s282_s22 }
  0x18   : > { %p1478_p13 = scmp.ne.s32.totalorder %s267_s19, %s1477_s23  ;;  %p1485_p5 = scmp.lt.s32.totalorder %s267_s19, %s267_s19 }
  0x19   : > { %p1794_p11 = pnand %p1349_p9, %p1765_p1  ;;  %p1486_p7 = scmp.lt.s32.totalorder %s1477_s23, %s1477_s23 }
  0x1b   : > { %p1468_p12 = pneg %p1794_p11  ;;  %p1487_p10 = por %p1486_p7, %p1485_p5 }
  0x1d   : > { %p1480_p0 = pnand %p1478_p13, %p1468_p12 }
  0x1f   : > { %p1481_p3 = pneg %p1480_p0 }
  0x21   : > { %p1488_p9 = pnand %p1487_p10, %p1481_p3 }
  0x23   : > { %1491 = shalt.err (!%p1488_p9)
}
  0x24   : > { %s1664_s24 = smov 64   ;;  %s1665_s25 = smov 4  }
  0x25   : > { %s2059_s1 = sld [smem:[#allocation18_spill]]  ;;  %s1503_s12 = scalar_lea.vmem %s283_s22, 256 }
  0x26   : > { %p1504_p6 = scmp.ne.s32.totalorder %s283_s22, %s1503_s12  ;;  %p1511_p1 = scmp.lt.s32.totalorder %s283_s22, %s283_s22 }
  0x27   : > { %p1512_p4 = scmp.lt.s32.totalorder %s1503_s12, %s1503_s12 }
  0x28   : > { %p1506_p13 = pnand %p1504_p6, %p1468_p12 }
  0x29   : > { %p1513_p5 = por %p1512_p4, %p1511_p1 }
  0x2a   : > { %p1507_p0 = pneg %p1506_p13 }
  0x2b   : > { %1352 = dma.hbm_to_vmem [thread:$0]  (!%p1794_p11), %s2059_s1, 256, %s267_s19, [#allocation7], %s1664_s24, %s1664_s24, %s1665_s25  }
  0x2c   : > { %p1514_p10 = pnand %p1513_p5, %p1507_p0 }
  0x2e   : > { %1517 = shalt.err (!%p1514_p10)
}
  0x2f   : > { %s2060_s3 = sld [smem:[#allocation19_spill]]  ;;  %s41_s19 = sadd.s32 1, %s1656_s9 }
  0x30   : > { %s48_s23 = sadd.s32 1, %s1648_s29  ;;  %p43_p1 = scmp.ge.s32.totalorder %s41_s19, 2 }
  0x31   : > { %p55_p4 = scmp.ne.s32.totalorder %s1648_s29, %s1644_s28  ;;  %p56_p6 = scmp.eq.s32.totalorder %s1660_s10, 0 }
  0x32   : > { %p1369_p12 = scmp.lt.s32.totalorder %s1660_s10, 2  ;;  %s2074_s19 = smov (%p43_p1, %s41_s19), 0 }
  0x33   : > { %2061 = sst [smem:[#allocation17_spill]] %s2074_s19  ;;  %p57_p3 = por %p56_p6, %p55_p4 }
  0x34   : > { %p1826_p7 = por %p1769_p2, %p55_p4  ;;  %s45_s26 = ssub.s32 %s1656_s9, %s2074_s19 }
  0x35   : > { %1355 = dma.hbm_to_vmem [thread:$0]  (!%p1794_p11), %s2060_s3, 256, %s283_s22, [#allocation7], %s1664_s24, %s1664_s24, %s1665_s25  }
  0x36   : > { %s305_s11 = sand.u32 1, %s1648_s29   ;;  %p46_p9 = scmp.eq.s32.totalorder %s45_s26, 0 }
  0x37   : > { %s1215_s22 = sshll.u32 %s305_s11, 3  ;;  %s1216_s24 = sshll.u32 %s1656_s9, 7 }
  0x38   : > { %s1835_s25 = scalar_select %p46_p9, %s1648_s29, %s48_s23  }
  0x39   : > { %s314_s21 = scalar_lea.hbm %s2036_s0, %s1216_s24  ;;  %s309_s1 = scalar_lea.vmem [#allocation3], %s1215_s22 }
  0x3a   : > { %s316_s3 = sshll.u32 %s309_s1, 4  ;;  %p1842_p11 = pnand %p1369_p12, %p57_p3  ;;  %s317_s3 = int_to_ptr.vmem [resolvable:$true] %s316_s3 }
  0x3b   : > { %s306_s19 = scalar_lea.sflag [#allocation4], %s305_s11  ;;  %s1531_s26 = scalar_lea.vmem %s317_s3, 128 }
  0x3c   : > { %p1520_p2 = pneg %p1842_p11  ;;  %p1532_p13 = scmp.ne.s32.totalorder %s317_s3, %s1531_s26 }
  0x3d   : > { %s1666_s23 = smov [#allocation3]  }
  0x3e   : > { %p1534_p0 = pnand %p1532_p13, %p1520_p2  ;;  %s1536_s9 = sshll.u32 %s1666_s23, 4  ;;  %s1537_s9 = int_to_ptr.vmem [resolvable:$false] %s1536_s9 }
  0x3f   : > { %s1538_s24 = scalar_lea.vmem %s1537_s9, 256  ;;  %p1539_p10 = scmp.lt.s32.totalorder %s317_s3, %s1537_s9 }
  0x40   : > { %p1535_p5 = pneg %p1534_p0  ;;  %p1540_p1 = scmp.lt.s32.totalorder %s1538_s24, %s1531_s26 }
  0x42   : > { %p1541_p4 = por %p1540_p1, %p1539_p10 }
  0x44   : > { %p1542_p6 = pnand %p1541_p4, %p1535_p5 }
  0x46   : > { %1545 = shalt.err (!%p1542_p6)
}
  0x47   : > { %1359 = dma.hbm_to_vmem [thread:$0]  (!%p1842_p11), %s314_s21, 128, %s317_s3, %s306_s19  }
  0x48   : > { %325 = sbr.rel (%p1785_p8) target bundleno = 1812 (0x714), region = 48  ;;  %s1853_s1 = sand.u32 (!%p1785_p8), 1, %s1644_s28  }
  0x49   : > { %s1856_s11 = sshll.u32 (!%p1785_p8), %s1853_s1, 3  ;;  %s328_s9 = scalar_lea.sflag (!%p1785_p8), [#allocation4], %s1853_s1 }
  0x4a   : > { %s331_s22 = scalar_lea.vmem (!%p1785_p8), [#allocation3], %s1856_s11  ;;  %p2064_p12 = scmp.ne.s32.totalorder (!%p1785_p8), %s2055_s15, 0 }
  0x4d   : > { %1623 = dma.done.wait (%p2064_p12), %s328_s9, 128  }
  0x4e   : > { %1625 = vsyncadd (%p2064_p12), %s328_s9, 4294967168  ;;  %p2065_p3 = scmp.ne.s32.totalorder %s2053_s13, 0 }
  0x50   : > { %1627 = dma.done.wait (%p2065_p3), [#allocation7], 512  }
  0x51   : > { %1629 = vsyncadd (%p2065_p3), [#allocation7], 4294966784  ;;  %vm384_vm0 = vcmask 261120   ;;  %v1868_v0 = vld [vmem:[%s331_s22] sm:$0xff]  ;;  %v1442_v7 = vld [vmem:[#allocation6 + $0x8] sm:$0xff]   ;;  %v1667_v8 = vmov 0.0   ;;  %v487_v41 = vlaneseq }
  0x52   : > { %v385_v1 = vsel %vm384_vm0, %v1868_v0, 0.0  ;;  %1271 = vmatprep.subr.bf16.mxu0 %v1667_v8  ;;  %vm1668_vm1 = vmmov 0   ;;  %v1443_v9 = vld [vmem:[#allocation6] sm:$0xff]   ;;  %1279 = vmatprep.subr.bf16.mxu1 %v1667_v8  ;;  %v1223_v14 = vld [vmem:[%s2041_s5] ss:$0 sm:$0xff]  ;;  %vm483_vm2 = vcmask 781312  }
  0x53   : > { %386 = vadd.xlane.f32.xlu0 %v385_v1  ;;  %1275 = vmatprep.mubr.msk.bf16.mxu0 %vm1668_vm1, %v1667_v8  ;;  %v1224_v16 = vld [vmem:[%s2042_s6] ss:$0 sm:$0xff]  ;;  %s1669_s18 = smov 96   ;;  %s1670_s21 = smov 120   ;;  %vm506_vm3 = vcmask 64512   ;;  %v488_v42 = vshrl.u32 %v487_v41, 7 }
  0x54   : > { %1272 = vmatpush3.bf16.msra.mxu0 %v1442_v7  ;;  %1281 = vmatprep.mubr.msk.bf16.mxu1 %vm1668_vm1, %v1667_v8  ;;  %v1225_v20 = vld [vmem:[%s2038_s2] ss:$0 sm:$0xff]  ;;  %s1671_s14 = smov 88   ;;  %s1672_s26 = smov 80   ;;  %v492_v43 = vand.u32 127, %v487_v41  ;;  %vm571_vm5 = vcmask 1043456  }
  0x55   : > { %1273 = vmatprep.subr.bf16.mxu0 %v1667_v8  ;;  %s1673_s23 = smov 112   ;;  %s1674_s24 = smov 72   ;;  %v1676_v44 = vmov -1e+09   ;;  %vm964_vm6 = vcmask 130048   ;;  %vm966_vm7 = vcmask 195584  }
  0x56   : > { %s1675_s9 = smov 104   ;;  %vm493_vm4 = vcmp.ge.s32.totalorder %v488_v42, %v492_v43  ;;  %s1677_s22 = smov 64  }
  0x57   : > { %v494_v45 = vsel %vm493_vm4, 0.0, %v1676_v44  ;;  %s1678_s3 = smov 56   ;;  %s1679_s13 = smov 48  }
  0x58   : > { %1274 = vmatpush3.bf16.msra.mxu0 %v1443_v9  ;;  %s1680_s15 = smov 40   ;;  %s376_s17 = scalar_lea.vmem [#allocation10], %s1856_s11 }
  0x59   : > { %1285 = vmatprep.subr.bf16.mxu0 %v1667_v8  ;;  %s1681_s19 = smov 8   ;;  %s1682_s12 = smov 16  }
  0xdc   : > { %v387_v2 = vpop.xlane.xlu0 %386 }
  0xdd   : > { %v389_v3 = vmul.f32 0.03125, %v387_v2 }
  0xdf   : > { %v390_v4 = vsub.f32 %v1868_v0, %v389_v3 }
  0xe1   : > { %v391_v5 = vmul.f32 %v390_v4, %v390_v4 }
  0xe3   : > { %v392_v6 = vsel %vm384_vm0, %v391_v5, 0.0 }
  0xe4   : > { %393 = vadd.xlane.f32.xlu0 %v392_v6 }
 0x16d   : > { %v394_v10 = vpop.xlane.xlu0 %393 }
 0x16e   : > { %v395_v11 = vmul.f32 0.03125, %v394_v10 }
 0x170   : > { %v396_v12 = vadd.f32 1e-05, %v395_v11 }
 0x172   : > { %1448 = vrsqrt.f32 %v396_v12 }
 0x17f   : > { %v1449_v13 = vpop.eup %1448 }
 0x180   : > { %v398_v15 = vmul.f32 %v1449_v13, %v390_v4 }
 0x182   : > { %v406_v17 = vmul.f32 %v1223_v14, %v398_v15 }
 0x184   : > { %v414_v18 = vadd.f32 %v1224_v16, %v406_v17 }
 0x186   : > { %v415_v19 = vpack.c.bf16 %v414_v18, %v414_v18 }
 0x188   : > { %1276 = vmatmul.mubr.msk.bf16.vlgmr.msra.gmra.mxu0 %vm384_vm0, %v415_v19 }
 0x189   : > { %1287 = vmatprep.mubr.msk.bf16.mxu0 %vm1668_vm1, %v1667_v8 }
 0x248   : > { %v476_v21 = vpop.f32.mrf.mxu0 }
 0x249   : > { %v477_v22 = vadd.f32 %v1225_v20, %v476_v21 }
 0x24a   : > { %v1277_v23 = vpop.f32.mrf.mxu0 }
 0x24b   : > { %v482_v24 = vpack.c.bf16 %v477_v22, %v477_v22 }
 0x24c   : > { %v479_v25 = vpop.f32.mrf.mxu0 }
 0x24d   : > { %484 = vst.msk [vmem:[#allocation2] sm:$0xf] %vm483_vm2, %v482_v24 }
 0x24e   : > { %v1278_v26 = vpop.f32.mrf.mxu0 }
 0x254   : > { %v1894_v27 = vld [vmem:[#allocation2] ss:$0 sps:$4 sm:$0xff]  }
 0x255   : > { %v499_v28 = vld [vmem:[#allocation2] sm:$0xf]  ;;  %504 = vrot.lane.b32.xlu1 %v1894_v27, %s1669_s18  ;;  %s1683_s18 = smov 24  }
 0x256   : > { %v1232_v29 = vcombine.low %v499_v28, %v499_v28 }
 0x258   : > { %618 = vrot.lane.b32.xlu0 %v1232_v29, %s1670_s21  ;;  %s1245_s21 = sshll.u32 %s1652_s30, 7 }
 0x259   : > { %620 = vrot.lane.b32.xlu1 %v1894_v27, %s1671_s14 }
 0x25d   : > { %731 = vrot.lane.b32.xlu1 %v1894_v27, %s1672_s26 }
 0x261   : > { %729 = vrot.lane.b32.xlu1 %v1232_v29, %s1673_s23  ;;  %s1072_s23 = scalar_lea.hbm %s2044_s8, %s1245_s21 }
 0x265   : > { %842 = vrot.lane.b32.xlu1 %v1894_v27, %s1674_s24  ;;  %s1074_s24 = sshll.u32 %s376_s17, 4  ;;  %s1075_s24 = int_to_ptr.vmem [resolvable:$true] %s1074_s24 }
 0x269   : > { %840 = vrot.lane.b32.xlu1 %v1232_v29, %s1675_s9  ;;  %s1046_s9 = scalar_lea.sflag [#allocation11], %s1853_s1 }
 0x2c7   : > { %v505_v30 = vpop.permute.xlu1 %504 }
 0x2c8   : > { %v511_v31 = vsel %vm506_vm3, %v505_v30, 0 }
 0x2c9   : > { %1280 = vmatpush3.bf16.xpose.msra.mxu1 %v511_v31 }
 0x2ca   : > { %1291 = vmatprep.subr.bf16.mxu1 %v1667_v8  ;;  %v619_v35 = vpop.permute.xlu0 %618 }
 0x2cb   : > { %v621_v32 = vpop.permute.xlu1 %620 }
 0x2cc   : > { %v626_v33 = vsel %vm506_vm3, %v621_v32, 0 }
 0x2cf   : > { %v732_v34 = vpop.permute.xlu1 %731 }
 0x2d0   : > { %1282 = vmatmul.mubr.msk.bf16.vlgmr.msra.gmra.mxu1 %vm506_vm3, %v499_v28  ;;  %v737_v37 = vsel %vm506_vm3, %v732_v34, 0 }
 0x2d1   : > { %1292 = vmatpush3.bf16.xpose.msra.mxu1 %v626_v33  ;;  %1293 = vmatprep.mubr.msk.bf16.mxu1 %vm1668_vm1, %v1667_v8 }
 0x2d2   : > { %1303 = vmatprep.subr.bf16.mxu1 %v1667_v8 }
 0x2d3   : > { %v730_v36 = vpop.permute.xlu1 %729 }
 0x2d7   : > { %v843_v38 = vpop.permute.xlu1 %842 }
 0x2d8   : > { %1294 = vmatmul.mubr.msk.bf16.vlgmr.msra.gmra.mxu1 %vm506_vm3, %v619_v35  ;;  %v848_v39 = vsel %vm506_vm3, %v843_v38, 0 }
 0x2d9   : > { %1304 = vmatpush3.bf16.xpose.msra.mxu1 %v737_v37  ;;  %1305 = vmatprep.mubr.msk.bf16.mxu1 %vm1668_vm1, %v1667_v8 }
 0x2da   : > { %1315 = vmatprep.subr.bf16.mxu1 %v1667_v8 }
 0x2db   : > { %v841_v40 = vpop.permute.xlu1 %840 }
 0x2e0   : > { %1306 = vmatmul.mubr.msk.bf16.vlgmr.msra.gmra.mxu1 %vm506_vm3, %v730_v36 }
 0x2e1   : > { %1316 = vmatpush3.bf16.xpose.msra.mxu1 %v848_v39  ;;  %1317 = vmatprep.mubr.msk.bf16.mxu1 %vm1668_vm1, %v1667_v8 }
 0x2e2   : > { %1327 = vmatprep.subr.bf16.mxu1 %v1667_v8 }
 0x2e8   : > { %1318 = vmatmul.mubr.msk.bf16.vlgmr.msra.gmra.mxu1 %vm506_vm3, %v841_v40 }
 0x2e9   : > { %1331 = vmatprep.mubr.msk.bf16.mxu1 %vm1668_vm1, %v1667_v8 }
 0x390   : > { %v547_v46 = vpop.f32.mrf.mxu1 }
 0x391   : > { %v548_v47 = vadd.f32 %v547_v46, %v494_v45 }
 0x392   : > { %v1283_v48 = vpop.f32.mrf.mxu1 }
 0x393   : > { %v553_v49 = vsel %vm506_vm3, %v548_v47, -inf }
 0x394   : > { %554 = vmax.xlane.f32.xlu1 %v553_v49  ;;  %v550_v50 = vpop.f32.mrf.mxu1 }
 0x396   : > { %v1284_v51 = vpop.f32.mrf.mxu1 }
 0x398   : > { %v662_v52 = vpop.f32.mrf.mxu1 }
 0x399   : > { %v663_v53 = vadd.f32 %v662_v52, %v494_v45 }
 0x39a   : > { %v1295_v54 = vpop.f32.mrf.mxu1 }
 0x39b   : > { %v668_v55 = vsel %vm506_vm3, %v663_v53, -inf }
 0x39c   : > { %669 = vmax.xlane.f32.xlu0 %v668_v55  ;;  %v665_v56 = vpop.f32.mrf.mxu1 }
 0x39e   : > { %v1296_v57 = vpop.f32.mrf.mxu1 }
 0x3a0   : > { %v773_v58 = vpop.f32.mrf.mxu1 }
 0x3a1   : > { %v774_v59 = vadd.f32 %v773_v58, %v494_v45 }
 0x3a2   : > { %v1307_v60 = vpop.f32.mrf.mxu1 }
 0x3a3   : > { %v779_v61 = vsel %vm506_vm3, %v774_v59, -inf }
 0x3a4   : > { %780 = vmax.xlane.f32.xlu1 %v779_v61  ;;  %v776_v62 = vpop.f32.mrf.mxu1 }
 0x3a6   : > { %v1308_v63 = vpop.f32.mrf.mxu1 }
 0x3a8   : > { %v884_v1 = vpop.f32.mrf.mxu1 }
 0x3a9   : > { %v885_v2 = vadd.f32 %v884_v1, %v494_v45  ;;  %v1446_v1 = vld [vmem:[#allocation8 + $0x8] sm:$0xff]  }
 0x3aa   : > { %v1319_v3 = vpop.f32.mrf.mxu1  ;;  %1328 = vmatpush3.bf16.msra.mxu1 %v1446_v1 }
 0x3ab   : > { %v890_v4 = vsel %vm506_vm3, %v885_v2, -inf  ;;  %1329 = vmatprep.subr.bf16.mxu1 %v1667_v8 }
 0x3ac   : > { %891 = vmax.xlane.f32.xlu0 %v890_v4  ;;  %v887_v5 = vpop.f32.mrf.mxu1 }
 0x3ae   : > { %v1320_v6 = vpop.f32.mrf.mxu1 }
 0x41d   : > { %v555_v7 = vpop.xlane.xlu1 %554 }
 0x41e   : > { %v556_v9 = vsub.f32 %v548_v47, %v555_v7 }
 0x420   : > { %v557_v10 = vmul.f32 1.442695, %v556_v9 }
 0x422   : > { %1450 = vpow2.f32 %v557_v10 }
 0x425   : > { %v670_v11 = vpop.xlane.xlu0 %669 }
 0x426   : > { %v671_v12 = vsub.f32 %v663_v53, %v670_v11 }
 0x428   : > { %v672_v13 = vmul.f32 1.442695, %v671_v12 }
 0x42a   : > { %1452 = vpow2.f32 %v672_v13 }
 0x42d   : > { %v781_v23 = vpop.xlane.xlu1 %780 }
 0x42e   : > { %v782_v24 = vsub.f32 %v774_v59, %v781_v23 }
 0x42f   : > { %v1451_v14 = vpop.eup %1450 }
 0x430   : > { %v559_v15 = vsel %vm506_vm3, %v1451_v14, 0.0  ;;  %v783_v25 = vmul.f32 1.442695, %v782_v24 }
 0x431   : > { %560 = vadd.xlane.f32.xlu1 %v559_v15 }
 0x435   : > { %v892_v16 = vpop.xlane.xlu0 %891 }
 0x436   : > { %v893_v17 = vsub.f32 %v885_v2, %v892_v16  ;;  %v1447_v2 = vld [vmem:[#allocation8] sm:$0xff]  }
 0x437   : > { %v1453_v18 = vpop.eup %1452  ;;  %1330 = vmatpush3.bf16.msra.mxu1 %v1447_v2 }
 0x438   : > { %v894_v19 = vmul.f32 1.442695, %v893_v17  ;;  %v674_v20 = vsel %vm506_vm3, %v1453_v18, 0.0 }
 0x439   : > { %675 = vadd.xlane.f32.xlu0 %v674_v20 }
 0x43a   : > { %1454 = vpow2.f32 %v894_v19 }
 0x43b   : > { %1456 = vpow2.f32 %v783_v25 }
 0x442   : > { %566 = vrot.lane.b32.xlu1 %v1894_v27, %s1677_s22  ;;  %s1546_s22 = scalar_lea.vmem %s1075_s24, 128 }
 0x443   : > { %p1547_p8 = scmp.ne.s32.totalorder %s1075_s24, %s1546_s22 }
 0x445   : > { %p1548_p9 = pnand %p1547_p8, %p1826_p7 }
 0x447   : > { %v1455_v21 = vpop.eup %1454  ;;  %p1549_p11 = pneg %p1548_p9 }
 0x448   : > { %v896_v22 = vsel %vm506_vm3, %v1455_v21, 0.0  ;;  %v1457_v26 = vpop.eup %1456 }
 0x449   : > { %897 = vadd.xlane.f32.xlu0 %v896_v22  ;;  %v785_v28 = vsel %vm506_vm3, %v1457_v26, 0.0 }
 0x45f   : > { %681 = vrot.lane.b32.xlu0 %v1894_v27, %s1678_s3  ;;  %s1684_s3 = smov [#allocation10]  }
 0x466   : > { %786 = vadd.xlane.f32.xlu1 %v785_v28 }
 0x477   : > { %792 = vrot.lane.b32.xlu1 %v1894_v27, %s1679_s13  ;;  %s1550_s13 = sshll.u32 %s1684_s3, 4  ;;  %s1551_s13 = int_to_ptr.vmem [resolvable:$false] %s1550_s13 }
 0x478   : > { %p1553_p2 = scmp.lt.s32.totalorder %s1075_s24, %s1551_s13 }
 0x47b   : > { %903 = vrot.lane.b32.xlu1 %v1894_v27, %s1680_s15  ;;  %s1552_s15 = scalar_lea.vmem %s1551_s13, 256 }
 0x47c   : > { %p1554_p13 = scmp.lt.s32.totalorder %s1552_s15, %s1546_s22 }
 0x47e   : > { %p1555_p0 = por %p1554_p13, %p1553_p2 }
 0x480   : > { %p1556_p5 = pnand %p1555_p0, %p1549_p11 }
 0x4ba   : > { %v561_v29 = vpop.xlane.xlu1 %560 }
 0x4bb   : > { %1458 = vrcp.f32 %v561_v29 }
 0x4be   : > { %v567_v30 = vpop.permute.xlu1 %566 }
 0x4bf   : > { %v573_v31 = vsel %vm571_vm5, %v567_v30, 0 }
 0x4c0   : > { %1286 = vmatpush3.bf16.msra.mxu0 %v573_v31 }
 0x4c1   : > { %1297 = vmatprep.subr.bf16.mxu0 %v1667_v8 }
 0x4c2   : > { %v676_v32 = vpop.xlane.xlu0 %675 }
 0x4c3   : > { %1460 = vrcp.f32 %v676_v32 }
 0x4c8   : > { %v1459_v33 = vpop.eup %1458 }
 0x4c9   : > { %v563_v34 = vmul.f32 %v1459_v33, %v1451_v14 }
 0x4cb   : > { %v565_v35 = vpack.c.bf16 %v563_v34, %v563_v34 }
 0x4cd   : > { %1288 = vmatmul.mubr.msk.bf16.vlgmr.msra.gmra.mxu0 %vm506_vm3, %v565_v35 }
 0x4ce   : > { %1299 = vmatprep.mubr.msk.bf16.mxu0 %vm1668_vm1, %v1667_v8 }
 0x4d0   : > { %v1461_v27 = vpop.eup %1460 }
 0x4d1   : > { %v678_v37 = vmul.f32 %v1461_v27, %v1453_v18 }
 0x4d2   : > { %v898_v36 = vpop.xlane.xlu0 %897 }
 0x4d3   : > { %v680_v40 = vpack.c.bf16 %v678_v37, %v678_v37  ;;  %1462 = vrcp.f32 %v898_v36  ;;  %v679_v46 = vadd.f32 %v678_v37, %v563_v34 }
 0x4d6   : > { %v682_v38 = vpop.permute.xlu0 %681 }
 0x4d7   : > { %v687_v39 = vsel %vm571_vm5, %v682_v38, 0 }
 0x4d8   : > { %1298 = vmatpush3.bf16.msra.mxu0 %v687_v39 }
 0x4d9   : > { %1309 = vmatprep.subr.bf16.mxu0 %v1667_v8 }
 0x4db   : > { %1300 = vmatmul.mubr.msk.bf16.vlgmr.msra.gmra.mxu0 %vm506_vm3, %v680_v40 }
 0x4dc   : > { %1311 = vmatprep.mubr.msk.bf16.mxu0 %vm1668_vm1, %v1667_v8 }
 0x4e0   : > { %v1463_v44 = vpop.eup %1462 }
 0x4e1   : > { %v900_v51 = vmul.f32 %v1463_v44, %v1455_v21 }
 0x4e3   : > { %v902_v55 = vpack.c.bf16 %v900_v51, %v900_v51 }
 0x4ef   : > { %v787_v41 = vpop.xlane.xlu1 %786 }
 0x4f0   : > { %1464 = vrcp.f32 %v787_v41 }
 0x4f3   : > { %v793_v42 = vpop.permute.xlu1 %792 }
 0x4f4   : > { %v798_v43 = vsel %vm571_vm5, %v793_v42, 0 }
 0x4f5   : > { %1310 = vmatpush3.bf16.msra.mxu0 %v798_v43 }
 0x4f6   : > { %1321 = vmatprep.subr.bf16.mxu0 %v1667_v8 }
 0x4f7   : > { %v904_v48 = vpop.permute.xlu1 %903 }
 0x4f8   : > { %v909_v52 = vsel %vm571_vm5, %v904_v48, 0 }
 0x4fd   : > { %v1465_v45 = vpop.eup %1464 }
 0x4fe   : > { %v789_v47 = vmul.f32 %v1465_v45, %v1457_v26 }
 0x500   : > { %v790_v49 = vadd.f32 %v789_v47, %v679_v46  ;;  %v791_v50 = vpack.c.bf16 %v789_v47, %v789_v47 }
 0x502   : > { %1312 = vmatmul.mubr.msk.bf16.vlgmr.msra.gmra.mxu0 %vm506_vm3, %v791_v50  ;;  %v901_v53 = vadd.f32 %v900_v51, %v790_v49 }
 0x503   : > { %1322 = vmatpush3.bf16.msra.mxu0 %v909_v52  ;;  %1323 = vmatprep.mubr.msk.bf16.mxu0 %vm1668_vm1, %v1667_v8 }
 0x504   : > { %v1038_v54 = vmul.f32 0.25, %v901_v53 }
 0x506   : > { %1039 = vst.msk [vmem:[%s376_s17] sm:$0xff] %vm506_vm3, %v1038_v54 }
 0x50a   : > { %1324 = vmatmul.mubr.msk.bf16.vlgmr.msra.gmra.mxu0 %vm506_vm3, %v902_v55 }
 0x58d   : > { %v609_v56 = vpop.f32.mrf.mxu0 }
 0x58f   : > { %v1289_v57 = vpop.f32.mrf.mxu0 }
 0x591   : > { %v612_v58 = vpop.f32.mrf.mxu0 }
 0x593   : > { %v1290_v59 = vpop.f32.mrf.mxu0 }
 0x59b   : > { %v723_v60 = vpop.f32.mrf.mxu0 }
 0x59c   : > { %952 = vrot.lane.b32.xlu0 %v723_v60, %s1681_s19 }
 0x59d   : > { %v1301_v61 = vpop.f32.mrf.mxu0 }
 0x59f   : > { %v726_v62 = vpop.f32.mrf.mxu0 }
 0x5a1   : > { %v1302_v63 = vpop.f32.mrf.mxu0 }
 0x5c2   : > { %v834_v3 = vpop.f32.mrf.mxu0 }
 0x5c3   : > { %956 = vrot.lane.b32.xlu1 %v834_v3, %s1682_s12 }
 0x5c4   : > { %v1313_v4 = vpop.f32.mrf.mxu0 }
 0x5c6   : > { %v837_v5 = vpop.f32.mrf.mxu0 }
 0x5c8   : > { %v1314_v6 = vpop.f32.mrf.mxu0 }
 0x5ca   : > { %v945_v7 = vpop.f32.mrf.mxu0 }
 0x5cb   : > { %960 = vrot.lane.b32.xlu0 %v945_v7, %s1683_s18 }
 0x5cc   : > { %v1325_v9 = vpop.f32.mrf.mxu0 }
 0x5ce   : > { %v948_v10 = vpop.f32.mrf.mxu0 }
 0x5d0   : > { %v1326_v11 = vpop.f32.mrf.mxu0 }
 0x60e   : > { %v953_v12 = vpop.permute.xlu0 %952 }
 0x60f   : > { %v963_v13 = vsel %vm506_vm3, %v609_v56, %v953_v12 }
 0x635   : > { %v957_v8 = vpop.permute.xlu1 %956 }
 0x636   : > { %v965_v14 = vsel %vm964_vm6, %v963_v13, %v957_v8 }
 0x63d   : > { %v961_v15 = vpop.permute.xlu0 %960 }
 0x63e   : > { %v967_v16 = vsel %vm966_vm7, %v965_v14, %v961_v15 }
 0x63f   : > { %v968_v17 = vpack.c.bf16 %v967_v16, %v967_v16 }
 0x641   : > { %1332 = vmatmul.mubr.msk.bf16.vlgmr.msra.gmra.mxu1 %vm384_vm0, %v968_v17 }
 0x642   : > { %1559 = shalt.err (!%p1556_p5)
}
 0x643   : > { %s1560_s19 = scalar_lea.hbm %s1072_s23, 128  ;;  %s1564_s18 = scalar_lea.hbm %s2044_s8, 256 }
 0x644   : > { %p1561_p10 = scmp.ne.s32.totalorder %s1072_s23, %s1560_s19  ;;  %p1565_p6 = scmp.lt.s32.totalorder %s1072_s23, %s2044_s8 }
 0x645   : > { %p1566_p12 = scmp.lt.s32.totalorder %s1564_s18, %s1560_s19 }
 0x646   : > { %p1562_p1 = pnand %p1561_p10, %p1826_p7 }
 0x647   : > { %p1567_p3 = por %p1566_p12, %p1565_p6 }
 0x648   : > { %p1563_p4 = pneg %p1562_p1 }
 0x64a   : > { %p1568_p8 = pnand %p1567_p3, %p1563_p4 }
 0x64c   : > { %1571 = shalt.err (!%p1568_p8)
}
 0x64d   : > { %1346 = dma.vmem_to_hbm [thread:$0]  (%p1826_p7), %s1075_s24, 128, %s1072_s23, %s1046_s9   ;;  %v1239_v18 = vld [vmem:[%s2040_s4] ss:$0 sm:$0xff] }
 0x64e   : > { %s369_s13 = scalar_lea.vmem [#allocation9], %s1856_s11  ;;  %s1987_s12 = scalar_lea.hbm %s2043_s7, %s1245_s21 }
 0x64f   : > { %s1060_s15 = sshll.u32 %s369_s13, 4  ;;  %s1041_s11 = scalar_lea.sflag [#allocation5], %s1853_s1  ;;  %s1989_s15 = int_to_ptr.vmem [resolvable:$true] %s1060_s15 }
 0x650   : > { %s1572_s23 = scalar_lea.vmem %s1989_s15, 128  ;;  %s1685_s30 = smov [#allocation9]  }
 0x651   : > { %p1573_p9 = scmp.ne.s32.totalorder %s1989_s15, %s1572_s23  ;;  %s1576_s24 = sshll.u32 %s1685_s30, 4  ;;  %s1577_s24 = int_to_ptr.vmem [resolvable:$false] %s1576_s24 }
 0x652   : > { %s1578_s21 = scalar_lea.vmem %s1577_s24, 256  ;;  %p1579_p13 = scmp.lt.s32.totalorder %s1989_s15, %s1577_s24 }
 0x653   : > { %p1574_p11 = pnand %p1573_p9, %p1826_p7  ;;  %p1580_p0 = scmp.lt.s32.totalorder %s1578_s21, %s1572_s23 }
 0x655   : > { %p1575_p2 = pneg %p1574_p11  ;;  %p1581_p5 = por %p1580_p0, %p1579_p13 }
 0x657   : > { %p1582_p10 = pnand %p1581_p5, %p1575_p2 }
 0x701   : > { %v1030_v19 = vpop.f32.mrf.mxu1 }
 0x702   : > { %v1031_v20 = vadd.f32 %v1239_v18, %v1030_v19 }
 0x703   : > { %v1333_v21 = vpop.f32.mrf.mxu1 }
 0x704   : > { %v1036_v22 = vadd.f32 %v1031_v20, %v1868_v0 }
 0x705   : > { %v1033_v23 = vpop.f32.mrf.mxu1 }
 0x706   : > { %1037 = vst.msk [vmem:[%s369_s13] sm:$0xff] %vm384_vm0, %v1036_v22 }
 0x707   : > { %v1334_v24 = vpop.f32.mrf.mxu1 }
 0x708   : > { %1585 = shalt.err (!%p1582_p10)
}
 0x709   : > { %s1586_s9 = scalar_lea.hbm %s1987_s12, 128  ;;  %s1590_s14 = scalar_lea.hbm %s2043_s7, 256 }
 0x70a   : > { %p1587_p1 = scmp.ne.s32.totalorder %s1987_s12, %s1586_s9  ;;  %p1591_p12 = scmp.lt.s32.totalorder %s1987_s12, %s2043_s7 }
 0x70b   : > { %p1592_p3 = scmp.lt.s32.totalorder %s1590_s14, %s1586_s9 }
 0x70c   : > { %p1588_p4 = pnand %p1587_p1, %p1826_p7 }
 0x70d   : > { %p1593_p8 = por %p1592_p3, %p1591_p12 }
 0x70e   : > { %p1589_p6 = pneg %p1588_p4 }
 0x710   : > { %p1594_p9 = pnand %p1593_p8, %p1589_p6 }
 0x712   : > { %1597 = shalt.err (!%p1594_p9)
}
 0x713   : > { %1345 = dma.vmem_to_hbm [thread:$0]  (%p1826_p7), %s1989_s15, 128, %s1987_s12, %s1041_s11  }
 0x714 PF: > { %s1086_s3 = sand.u32 1, %s1640_s27   ;;  %p2066_p11 = scmp.ne.s32.totalorder %s2056_s16, 0 }
 0x715   : > { %p2067_p2 = scmp.ge.s32.totalorder %s1660_s10, 2  ;;  %s1087_s13 = scalar_lea.sflag [#allocation5], %s1086_s3 }
 0x717   : > { %p1361_p13 = pnand %p2067_p2, %p2066_p11 }
 0x719   : > { %p1362_p0 = pneg %p1361_p13 }
 0x71b   : > { %1631 = dma.done.wait (%p1362_p0), %s1087_s13, 128  }
 0x71c   : > { %1633 = vsyncadd (%p1362_p0), %s1087_s13, 4294967168  ;;  %s1096_s19 = scalar_lea.sflag [#allocation11], %s1086_s3 }
 0x71d   : > { %1635 = dma.done.wait (%p1362_p0), %s1096_s19, 128  }
 0x71e   : > { %1637 = vsyncadd (%p1362_p0), %s1096_s19, 4294967168  ;;  %s29_s10 = sadd.s32 1, %s1660_s10   ;;  %s2068_s30 = sld [smem:[#allocation16_spill]] }
 0x71f   : > { %p26_p5 = scmp.ge.s32.totalorder %s29_s10, 4   ;;  %s2069_s9 = sld [smem:[#allocation17_spill]] }
 0x720   : > { %s2070_s27 = smov %s1644_s28  ;;  %s2071_s28 = smov %s1648_s29 }
 0x721   : > { %s2072_s29 = smov %s1835_s25  ;;  %28 = sbr.rel (!%p26_p5) target bundleno = 12 (0xc), region = 124 }
 0x726   :  { %1101 = vsyncpa [#allocation4], 1 }
 0x727   :  { %1103 = vsyncpa [#allocation4 + $0x1], 1 }
 0x728   :  { %1104 = vsyncpa [#allocation7], 1 }
 0x729   :  { %1105 = vsyncpa [#allocation5], 1 }
 0x72a   :  { %1107 = vsyncpa [#allocation5 + $0x1], 1 }
 0x72b   :  { %1108 = vsyncpa [#allocation11], 1 }
 0x72c   :  { %1110 = vsyncpa [#allocation11 + $0x1], 1 }

</bundles_post_ra>
